<compile_context>
chip_gen: v7x
topology: tpu7x:2x2x1
jax: 0.10.0
libtpu: 0.0.40
codegen_flags: <defaults>
</compile_context>

<pallas_src>
import functools
import math

import jax
import jax.numpy as jnp
from jax.experimental import pallas as pl
from jax.experimental.pallas import tpu as pltpu

BN_EPS = 1e-5  # torch.nn.BatchNorm1d default eps


def _pick_tile(dim, pref=512, align=128):
    """Largest multiple of `align` that divides `dim` and is <= `pref`."""
    best = align
    t = align
    while t <= min(pref, dim):
        if dim % t == 0:
            best = t
        t += align
    return best


# --------------------------------------------------------------- kernel 1
def support_kernel(x_ref, w_ref, out_ref):
    # support = x @ W : bf16 operands on the MXU, f32 accumulation, bf16 store.
    out_ref[...] = jnp.dot(
        x_ref[...], w_ref[...], preferred_element_type=jnp.float32
    ).astype(out_ref.dtype)


# --------------------------------------------------------------- kernel 2
def aggregate_kernel(adj_ref, sup_ref, raw_ref, stats_ref, acc_ref, *,
                     tk, sup_resident):
    # raw = adj @ support, tiled over (row tile i [parallel], contraction tile k
    # [arbitrary, last]).  At the last k step, emit the row tile plus per-tile
    # BatchNorm partials: [row-sum ; centered sum-of-squares ; 6 zero pad rows].
    k = pl.program_id(1)

    @pl.when(k == 0)
    def _():
        acc_ref[...] = jnp.zeros_like(acc_ref)

    if sup_resident:
        # Whole support matrix resident in VMEM; slice the contraction window.
        start = pl.multiple_of(k * tk, tk)
        sup = sup_ref[pl.ds(start, tk), :]
    else:
        sup = sup_ref[...]

    acc_ref[...] += jnp.dot(adj_ref[...], sup, preferred_element_type=jnp.float32)

    @pl.when(k == pl.num_programs(1) - 1)
    def _():
        raw_ref[...] = acc_ref[...]
        tm = acc_ref.shape[0]
        # Stream reductions from the VMEM scratch (keeps vreg pressure low).
        s = jnp.sum(acc_ref[...], axis=0, keepdims=True)                 # (1, F)
        m2 = jnp.sum((acc_ref[...] - s * (1.0 / tm)) ** 2,
                     axis=0, keepdims=True)                              # (1, F)
        pad = jnp.zeros((6, s.shape[1]), jnp.float32)
        stats_ref[...] = jnp.concatenate([s, m2, pad], axis=0)[None]     # (1,8,F)


# --------------------------------------------------------------- kernel 3
def bn_relu_kernel(raw_ref, bnp_ref, out_ref):
    # BatchNorm1d(affine=False) + ReLU using precomputed per-feature mean/inv_std.
    mean = bnp_ref[0:1, :]
    inv_std = bnp_ref[1:2, :]
    out_ref[...] = jnp.maximum((raw_ref[...] - mean) * inv_std, 0.0)


@jax.jit
def gcn_layer(adj, x, weights):
    """adj: (N, N), x: (N, F_in), weights: (F_in, F_out) -> (N, F_out) f32."""
    n, f_in = x.shape
    f_out = weights.shape[1]
    assert adj.shape == (n, n)
    assert weights.shape[0] == f_in
    assert n % 128 == 0 and f_out % 128 == 0, "pad N / F_out to multiples of 128"

    # bf16 operands: full-rate MXU, half the HBM bytes for the dominant N^2 adj.
    adj = adj.astype(jnp.bfloat16)
    x = x.astype(jnp.bfloat16)
    weights = weights.astype(jnp.bfloat16)

    tm = _pick_tile(n)          # node-row tile (output / BN batch axis)
    tk = _pick_tile(n)          # contraction tile over the node axis
    n_row_tiles = n // tm

    # 1) support = x @ W
    support = pl.pallas_call(
        support_kernel,
        out_shape=jax.ShapeDtypeStruct((n, f_out), jnp.bfloat16),
        grid=(n_row_tiles,),
        in_specs=[
            pl.BlockSpec((tm, f_in), lambda i: (i, 0)),
            pl.BlockSpec((f_in, f_out), lambda i: (0, 0)),
        ],
        out_specs=pl.BlockSpec((tm, f_out), lambda i: (i, 0)),
        compiler_params=pltpu.CompilerParams(dimension_semantics=("parallel",)),
    )(x, weights)

    # 2) raw = adj @ support, plus per-row-tile BatchNorm partial stats.
    sup_bytes = n * f_out * 2
    sup_resident = sup_bytes <= 8 * 1024 * 1024
    if sup_resident:
        sup_spec = pl.BlockSpec((n, f_out), lambda i, k: (0, 0))   # DMA'd once
        sup_vmem = 2 * sup_bytes                                    # conservative
    else:
        sup_spec = pl.BlockSpec((tk, f_out), lambda i, k: (k, 0))
        sup_vmem = 2 * tk * f_out * 2

    # VMEM budget (count double-buffering), kept under v7x's 64 MiB physical.
    agg_vmem = (2 * tm * tk * 2          # adj tiles (bf16, double-buffered)
                + sup_vmem               # support
                + 2 * tm * f_out * 4     # raw out tiles (f32)
                + 2 * 8 * f_out * 4      # stats out tiles
                + tm * f_out * 4)        # f32 accumulator scratch
    vmem_limit = int(min(64 * 1024 * 1024,
                         max(32 * 1024 * 1024, agg_vmem + (4 << 20))))

    raw, part_stats = pl.pallas_call(
        functools.partial(aggregate_kernel, tk=tk, sup_resident=sup_resident),
        out_shape=(
            jax.ShapeDtypeStruct((n, f_out), jnp.float32),
            jax.ShapeDtypeStruct((n_row_tiles, 8, f_out), jnp.float32),
        ),
        grid=(n_row_tiles, n // tk),
        in_specs=[
            pl.BlockSpec((tm, tk), lambda i, k: (i, k)),
            sup_spec,
        ],
        out_specs=(
            pl.BlockSpec((tm, f_out), lambda i, k: (i, 0)),
            pl.BlockSpec((1, 8, f_out), lambda i, k: (i, 0, 0)),
        ),
        scratch_shapes=[pltpu.VMEM((tm, f_out), jnp.float32)],
        compiler_params=pltpu.CompilerParams(
            dimension_semantics=("parallel", "arbitrary"),
            vmem_limit_bytes=vmem_limit),
    )(adj, support)

    # Combine per-tile partials (tiny (n_row_tiles, F) arrays) with a parallel
    # Welford merge: centered variance, no E[x^2]-mean^2 cancellation.
    tile_sum = part_stats[:, 0, :]                       # (T, F)
    tile_m2 = part_stats[:, 1, :]                        # (T, F)
    mean = jnp.sum(tile_sum, axis=0) / n                 # (F,)
    tile_mean = tile_sum / tm
    var = (jnp.sum(tile_m2, axis=0)
           + tm * jnp.sum((tile_mean - mean[None, :]) ** 2, axis=0)) / n  # biased
    inv_std = jax.lax.rsqrt(jnp.maximum(var, 0.0) + BN_EPS)
    bn_params = (jnp.zeros((8, f_out), jnp.float32)
                 .at[0].set(mean)
                 .at[1].set(inv_std))

    # 3) normalize + ReLU; raw aliased into the output buffer.
    return pl.pallas_call(
        bn_relu_kernel,
        out_shape=jax.ShapeDtypeStruct((n, f_out), jnp.float32),
        grid=(n_row_tiles,),
        in_specs=[
            pl.BlockSpec((tm, f_out), lambda i: (i, 0)),
            pl.BlockSpec((8, f_out), lambda i: (0, 0)),
        ],
        out_specs=pl.BlockSpec((tm, f_out), lambda i: (i, 0)),
        input_output_aliases={0: 0},
        compiler_params=pltpu.CompilerParams(dimension_semantics=("parallel",)),
    )(raw, bn_params)


def reference(adj, x, weights):
    support = x @ weights
    out = adj @ support
    mean = jnp.mean(out, axis=0, keepdims=True)
    var = jnp.mean((out - mean) ** 2, axis=0, keepdims=True)   # biased variance
    normed = (out - mean) / jnp.sqrt(var + BN_EPS)
    return jnp.maximum(normed, 0.0)


if __name__ == "__main__":
    key = jax.random.PRNGKey(0)
    k_adj, k_x, k_w = jax.random.split(key, 3)

    # Small, lane-dense demo sizes (production graphs would use N >= 2048).
    N = 256       # number of graph nodes (BatchNorm1d batch axis)
    F_IN = 128    # input_features
    F_OUT = 128   # output_features

    # Parameter init mirroring reset_parameters(): uniform(-std, std), std=1/sqrt(F_OUT).
    std = 1.0 / math.sqrt(F_OUT)
    weights = jax.random.uniform(
        k_w, (F_IN, F_OUT), dtype=jnp.float32, minval=-std, maxval=std)

    # Symmetric adjacency-like matrix and node features.
    a = jax.random.uniform(k_adj, (N, N), dtype=jnp.float32)
    adj = (a + a.T) * 0.5
    x = jax.random.normal(k_x, (N, F_IN), dtype=jnp.float32)

    # Cast once to bf16 (what the kernel consumes); reference sees the same values.
    adj_bf = adj.astype(jnp.bfloat16)
    x_bf = x.astype(jnp.bfloat16)
    w_bf = weights.astype(jnp.bfloat16)

    out = jax.block_until_ready(gcn_layer(adj_bf, x_bf, w_bf))

    ref = reference(
        adj_bf.astype(jnp.float32),
        x_bf.astype(jnp.float32),
        w_bf.astype(jnp.float32),
    )
    assert out.shape == (N, F_OUT)
    # bf16 operands + bf16 support between matmuls -> loosened tolerance.
    assert bool(jnp.allclose(out, ref, atol=5e-2, rtol=5e-2)), "mismatch vs reference"

    print("KERNEL_OK")
</pallas_src>

<mosaic_0001>
module attributes {stable_mosaic.version = 11 : i64} {
  func.func @support_kernel(%arg0: i32, %arg1: memref<256x128xbf16, #tpu.memory_space<vmem>>, %arg2: memref<128x128xbf16, #tpu.memory_space<vmem>>, %arg3: memref<256x128xbf16, #tpu.memory_space<vmem>>) attributes {dimension_semantics = [#tpu.dimension_semantics<parallel>], iteration_bounds = array<i64: 1>, scalar_prefetch = 0 : i64, scratch_operands = 0 : i64, tpu.core_type = #tpu.core_type<tc>, window_params = [{transform_indices = @transform_0, window_bounds = array<i64: 256, 128>}, {pipeline_mode = #tpu.pipeline_mode<synchronous>, transform_indices = @transform_1, window_bounds = array<i64: 128, 128>}, {transform_indices = @transform_2, window_bounds = array<i64: 256, 128>}]} {
    %c0 = arith.constant 0 : index
    %c0_0 = arith.constant 0 : index
    %0 = vector.load %arg1[%c0, %c0_0] : memref<256x128xbf16, #tpu.memory_space<vmem>>, vector<256x128xbf16>
    %c0_1 = arith.constant 0 : index
    %c0_2 = arith.constant 0 : index
    %1 = vector.load %arg2[%c0_1, %c0_2] : memref<128x128xbf16, #tpu.memory_space<vmem>>, vector<128x128xbf16>
    %cst = arith.constant dense<0.000000e+00> : vector<256x128xf32>
    %2 = tpu.matmul %0, %1, %cst {dimension_numbers = #tpu.dot_dimension_numbers<[1], [0], [0], [1], [0, 0, 1, 1], [], []>} : vector<256x128xbf16>, vector<128x128xbf16>, vector<256x128xf32> -> vector<256x128xf32>
    %3 = arith.truncf %2 : vector<256x128xf32> to vector<256x128xbf16>
    %c0_3 = arith.constant 0 : index
    %c0_4 = arith.constant 0 : index
    %4 = vector.load %arg3[%c0_3, %c0_4] : memref<256x128xbf16, #tpu.memory_space<vmem>>, vector<256x128xbf16>
    tpu.vector_store %arg3[%c0_3, %c0_4], %3 {strides = array<i32>} : memref<256x128xbf16, #tpu.memory_space<vmem>>, vector<256x128xbf16>,
    return
  }
  func.func @transform_0(%arg0: i32) -> (i32, i32) {
    %c0_i32 = arith.constant 0 : i32
    %c0_i32_0 = arith.constant 0 : i32
    return %arg0, %c0_i32 : i32, i32
  }
  func.func @transform_1(%arg0: i32) -> (i32, i32) {
    %c0_i32 = arith.constant 0 : i32
    %c0_i32_0 = arith.constant 0 : i32
    %c0_i32_1 = arith.constant 0 : i32
    return %c0_i32, %c0_i32_0 : i32, i32
  }
  func.func @transform_2(%arg0: i32) -> (i32, i32) {
    %c0_i32 = arith.constant 0 : i32
    %c0_i32_0 = arith.constant 0 : i32
    return %arg0, %c0_i32 : i32, i32
  }
}

module attributes {stable_mosaic.version = 11 : i64} {
  func.func @aggregate_kernel(%arg0: i32, %arg1: i32, %arg2: memref<256x256xbf16, #tpu.memory_space<vmem>>, %arg3: memref<256x128xbf16, #tpu.memory_space<vmem>>, %arg4: memref<256x128xf32, #tpu.memory_space<vmem>>, %arg5: memref<1x8x128xf32, #tpu.memory_space<vmem>>, %arg6: memref<256x128xf32, #tpu.memory_space<vmem>>) attributes {dimension_semantics = [#tpu.dimension_semantics<parallel>, #tpu.dimension_semantics<arbitrary>], iteration_bounds = array<i64: 1, 1>, scalar_prefetch = 0 : i64, scratch_operands = 1 : i64, tpu.core_type = #tpu.core_type<tc>, window_params = [{transform_indices = @transform_0, window_bounds = array<i64: 256, 256>}, {pipeline_mode = #tpu.pipeline_mode<synchronous>, transform_indices = @transform_1, window_bounds = array<i64: 256, 128>}, {transform_indices = @transform_2, window_bounds = array<i64: 256, 128>}, {transform_indices = @transform_3, window_bounds = array<i64: 1, 8, 128>}]} {
    %c0_i32 = arith.constant 0 : i32
    %0 = arith.cmpi eq, %arg1, %c0_i32 : i32
    %1 = arith.extui %0 : i1 to i32
    %c0_i32_0 = arith.constant 0 : i32
    %2 = arith.cmpi ne, %1, %c0_i32_0 : i32
    scf.if %2 {
      %cst_9 = arith.constant 0.000000e+00 : f32
      %15 = vector.broadcast %cst_9 : f32 to vector<256x128xf32>
      %c0_10 = arith.constant 0 : index
      %c0_11 = arith.constant 0 : index
      %16 = vector.load %arg6[%c0_10, %c0_11] : memref<256x128xf32, #tpu.memory_space<vmem>>, vector<256x128xf32>
      tpu.vector_store %arg6[%c0_10, %c0_11], %15 {strides = array<i32>} : memref<256x128xf32, #tpu.memory_space<vmem>>, vector<256x128xf32>,
    } else {
    }
    %c256_i32 = arith.constant 256 : i32
    %3 = arith.muli %arg1, %c256_i32 : i32
    %4 = tpu.assume_multiple %3, 256 : i32
    %5 = arith.index_cast %4 : i32 to index
    %c0 = arith.constant 0 : index
    %6 = vector.load %arg3[%5, %c0] : memref<256x128xbf16, #tpu.memory_space<vmem>>, vector<256x128xbf16>
    %c0_1 = arith.constant 0 : index
    %c0_2 = arith.constant 0 : index
    %7 = vector.load %arg6[%c0_1, %c0_2] : memref<256x128xf32, #tpu.memory_space<vmem>>, vector<256x128xf32>
    %c0_3 = arith.constant 0 : index
    %c0_4 = arith.constant 0 : index
    %8 = vector.load %arg2[%c0_3, %c0_4] : memref<256x256xbf16, #tpu.memory_space<vmem>>, vector<256x256xbf16>
    %cst = arith.constant dense<0.000000e+00> : vector<256x128xf32>
    %9 = tpu.matmul %8, %6, %cst {dimension_numbers = #tpu.dot_dimension_numbers<[1], [0], [0], [1], [0, 0, 1, 1], [], []>} : vector<256x256xbf16>, vector<256x128xbf16>, vector<256x128xf32> -> vector<256x128xf32>
    %10 = arith.addf %7, %9 : vector<256x128xf32>
    %c0_5 = arith.constant 0 : index
    %c0_6 = arith.constant 0 : index
    %11 = vector.load %arg6[%c0_5, %c0_6] : memref<256x128xf32, #tpu.memory_space<vmem>>, vector<256x128xf32>
    tpu.vector_store %arg6[%c0_5, %c0_6], %10 {strides = array<i32>} : memref<256x128xf32, #tpu.memory_space<vmem>>, vector<256x128xf32>,
    %c0_i32_7 = arith.constant 0 : i32
    %12 = arith.cmpi eq, %arg1, %c0_i32_7 : i32
    %13 = arith.extui %12 : i1 to i32
    %c0_i32_8 = arith.constant 0 : i32
    %14 = arith.cmpi ne, %13, %c0_i32_8 : i32
    scf.if %14 {
      %c0_9 = arith.constant 0 : index
      %c0_10 = arith.constant 0 : index
      %15 = vector.load %arg6[%c0_9, %c0_10] : memref<256x128xf32, #tpu.memory_space<vmem>>, vector<256x128xf32>
      %c0_11 = arith.constant 0 : index
      %c0_12 = arith.constant 0 : index
      %16 = vector.load %arg4[%c0_11, %c0_12] : memref<256x128xf32, #tpu.memory_space<vmem>>, vector<256x128xf32>
      tpu.vector_store %arg4[%c0_11, %c0_12], %15 {strides = array<i32>} : memref<256x128xf32, #tpu.memory_space<vmem>>, vector<256x128xf32>,
      %c0_13 = arith.constant 0 : index
      %c0_14 = arith.constant 0 : index
      %17 = vector.load %arg6[%c0_13, %c0_14] : memref<256x128xf32, #tpu.memory_space<vmem>>, vector<256x128xf32>
      %cst_15 = arith.constant dense<0.000000e+00> : vector<128xf32>
      %18 = vector.multi_reduction <add>, %17, %cst_15 [0] : vector<256x128xf32> to vector<128xf32>
      %19 = vector.shape_cast %18 : vector<128xf32> to vector<1x128xf32>
      %c0_16 = arith.constant 0 : index
      %c0_17 = arith.constant 0 : index
      %20 = vector.load %arg6[%c0_16, %c0_17] : memref<256x128xf32, #tpu.memory_space<vmem>>, vector<256x128xf32>
      %cst_18 = arith.constant 3.906250e-03 : f32
      %21 = vector.broadcast %cst_18 : f32 to vector<1x128xf32>
      %22 = arith.mulf %19, %21 : vector<1x128xf32>
      %23 = vector.broadcast %22 : vector<1x128xf32> to vector<256x128xf32>
      %24 = arith.subf %20, %23 : vector<256x128xf32>
      %25 = arith.mulf %24, %24 : vector<256x128xf32>
      %cst_19 = arith.constant dense<0.000000e+00> : vector<128xf32>
      %26 = vector.multi_reduction <add>, %25, %cst_19 [0] : vector<256x128xf32> to vector<128xf32>
      %27 = vector.shape_cast %26 : vector<128xf32> to vector<1x128xf32>
      %cst_20 = arith.constant 0.000000e+00 : f32
      %28 = vector.broadcast %cst_20 : f32 to vector<6x128xf32>
      %29 = tpu.concatenate %19, %27, %28 in 0 : vector<1x128xf32>, vector<1x128xf32>, vector<6x128xf32> -> vector<8x128xf32>
      %30 = vector.shape_cast %29 : vector<8x128xf32> to vector<1x8x128xf32>
      %c0_21 = arith.constant 0 : index
      %c0_22 = arith.constant 0 : index
      %c0_23 = arith.constant 0 : index
      %31 = vector.load %arg5[%c0_21, %c0_22, %c0_23] : memref<1x8x128xf32, #tpu.memory_space<vmem>>, vector<1x8x128xf32>
      tpu.vector_store %arg5[%c0_21, %c0_22, %c0_23], %30 {strides = array<i32>} : memref<1x8x128xf32, #tpu.memory_space<vmem>>, vector<1x8x128xf32>,
    } else {
    }
    return
  }
  func.func @transform_0(%arg0: i32, %arg1: i32) -> (i32, i32) {
    %c0_i32 = arith.constant 0 : i32
    return %arg0, %arg1 : i32, i32
  }
  func.func @transform_1(%arg0: i32, %arg1: i32) -> (i32, i32) {
    %c0_i32 = arith.constant 0 : i32
    %c0_i32_0 = arith.constant 0 : i32
    %c0_i32_1 = arith.constant 0 : i32
    return %c0_i32, %c0_i32_0 : i32, i32
  }
  func.func @transform_2(%arg0: i32, %arg1: i32) -> (i32, i32) {
    %c0_i32 = arith.constant 0 : i32
    %c0_i32_0 = arith.constant 0 : i32
    return %arg0, %c0_i32 : i32, i32
  }
  func.func @transform_3(%arg0: i32, %arg1: i32) -> (i32, i32, i32) {
    %c0_i32 = arith.constant 0 : i32
    %c0_i32_0 = arith.constant 0 : i32
    %c0_i32_1 = arith.constant 0 : i32
    return %arg0, %c0_i32, %c0_i32_0 : i32, i32, i32
  }
}

module attributes {stable_mosaic.version = 11 : i64} {
  func.func @bn_relu_kernel(%arg0: i32, %arg1: memref<256x128xf32, #tpu.memory_space<vmem>>, %arg2: memref<8x128xf32, #tpu.memory_space<vmem>>, %arg3: memref<256x128xf32, #tpu.memory_space<vmem>>) attributes {dimension_semantics = [#tpu.dimension_semantics<parallel>], iteration_bounds = array<i64: 1>, scalar_prefetch = 0 : i64, scratch_operands = 0 : i64, tpu.core_type = #tpu.core_type<tc>, window_params = [{transform_indices = @transform_0, window_bounds = array<i64: 256, 128>}, {pipeline_mode = #tpu.pipeline_mode<synchronous>, transform_indices = @transform_1, window_bounds = array<i64: 8, 128>}, {transform_indices = @transform_2, window_bounds = array<i64: 256, 128>}]} {
    %c0 = arith.constant 0 : index
    %c0_0 = arith.constant 0 : index
    %0 = vector.load %arg2[%c0, %c0_0] : memref<8x128xf32, #tpu.memory_space<vmem>>, vector<1x128xf32>
    %c1 = arith.constant 1 : index
    %c0_1 = arith.constant 0 : index
    %1 = vector.load %arg2[%c1, %c0_1] : memref<8x128xf32, #tpu.memory_space<vmem>>, vector<1x128xf32>
    %c0_2 = arith.constant 0 : index
    %c0_3 = arith.constant 0 : index
    %2 = vector.load %arg1[%c0_2, %c0_3] : memref<256x128xf32, #tpu.memory_space<vmem>>, vector<256x128xf32>
    %3 = vector.broadcast %0 : vector<1x128xf32> to vector<256x128xf32>
    %4 = arith.subf %2, %3 : vector<256x128xf32>
    %5 = vector.broadcast %1 : vector<1x128xf32> to vector<256x128xf32>
    %6 = arith.mulf %4, %5 : vector<256x128xf32>
    %cst = arith.constant 0.000000e+00 : f32
    %7 = vector.broadcast %cst : f32 to vector<256x128xf32>
    %8 = arith.maximumf %6, %7 : vector<256x128xf32>
    %c0_4 = arith.constant 0 : index
    %c0_5 = arith.constant 0 : index
    %9 = vector.load %arg3[%c0_4, %c0_5] : memref<256x128xf32, #tpu.memory_space<vmem>>, vector<256x128xf32>
    tpu.vector_store %arg3[%c0_4, %c0_5], %8 {strides = array<i32>} : memref<256x128xf32, #tpu.memory_space<vmem>>, vector<256x128xf32>,
    return
  }
  func.func @transform_0(%arg0: i32) -> (i32, i32) {
    %c0_i32 = arith.constant 0 : i32
    %c0_i32_0 = arith.constant 0 : i32
    return %arg0, %c0_i32 : i32, i32
  }
  func.func @transform_1(%arg0: i32) -> (i32, i32) {
    %c0_i32 = arith.constant 0 : i32
    %c0_i32_0 = arith.constant 0 : i32
    %c0_i32_1 = arith.constant 0 : i32
    return %c0_i32, %c0_i32_0 : i32, i32
  }
  func.func @transform_2(%arg0: i32) -> (i32, i32) {
    %c0_i32 = arith.constant 0 : i32
    %c0_i32_0 = arith.constant 0 : i32
    return %arg0, %c0_i32 : i32, i32
  }
}

</mosaic_0001>

<bundles_post_ra>
// kernel: gcn_layer.3
= control target key start
LH: loop header
LB: loop body
LE: loop exit
PB: predicated region body
PF: predicated region fallthrough
CT: control target
= control target key end

     0   :  { %7 = vsyncpa [#allocation3], 0  ;;  %s997_s0 = inlined_call_operand.hbm [shape: bf16[256,128], index: 0, kind: input, shape index: {}]   ;;  %s998_s1 = inlined_call_operand.hbm [shape: bf16[128,128], index: 1, kind: input, shape index: {}]   ;;  %s999_s2 = inlined_call_operand.vmem [shape: bf16[256,128], index: 2, kind: output, shape index: {}]  }
   0x1   :  { %8 = vsyncpa [#allocation5], 0  ;;  %s906_s9 = smov [#allocation2]   ;;  %s858_s13 = scalar_lea.hbm %s997_s0, 2048 }
   0x2   :  { %s14_s10 = sshll.u32 %s906_s9, 4  ;;  %p859_p0 = scmp.ne.s32.totalorder %s997_s0, %s858_s13  ;;  %s15_s10 = int_to_ptr.vmem [resolvable:$true] %s14_s10 }
   0x3   :  { %p862_p1 = scmp.lt.u32.totalorder %s858_s13, %s997_s0 }
   0x5   :  { %p864_p2 = pnand %p862_p1, %p859_p0 }
   0x7   :  { %867 = shalt.err (!%p864_p2)
}
   0x8   :  { %s868_s18 = scalar_lea.vmem %s15_s10, 2048  ;;  %p873_p4 = scmp.lt.s32.totalorder %s15_s10, %s15_s10 }
   0x9   :  { %p869_p3 = scmp.ne.s32.totalorder %s15_s10, %s868_s18  ;;  %p874_p5 = scmp.lt.s32.totalorder %s868_s18, %s868_s18 }
   0xb   :  { %p875_p6 = por %p874_p5, %p873_p4 }
   0xd   :  { %p876_p7 = pnand %p875_p6, %p869_p3 }
   0xf   :  { %879 = shalt.err (!%p876_p7)
}
  0x10   :  { %s907_s19 = smov 64   ;;  %s908_s20 = smov 4  }
  0x11   :  { %20 = dma.hbm_to_vmem [thread:$0]  %s997_s0, 2048, %s15_s10, [#allocation3], %s907_s19, %s907_s19, %s908_s20  }
  0x12   :  { %s909_s23 = smov [#allocation4]   ;;  %s880_s27 = scalar_lea.hbm %s998_s1, 1024 }
  0x13   :  { %s26_s24 = sshll.u32 %s909_s23, 4  ;;  %p881_p8 = scmp.ne.s32.totalorder %s998_s1, %s880_s27  ;;  %s27_s24 = int_to_ptr.vmem [resolvable:$true] %s26_s24 }
  0x14   :  { %p884_p9 = scmp.lt.u32.totalorder %s880_s27, %s998_s1 }
  0x16   :  { %p886_p10 = pnand %p884_p9, %p881_p8 }
  0x18   :  { %889 = shalt.err (!%p886_p10)
}
  0x19   :  { %s890_s4 = scalar_lea.vmem %s27_s24, 1024  ;;  %p895_p12 = scmp.lt.s32.totalorder %s27_s24, %s27_s24 }
  0x1a   :  { %p891_p11 = scmp.ne.s32.totalorder %s27_s24, %s890_s4  ;;  %p896_p13 = scmp.lt.s32.totalorder %s890_s4, %s890_s4 }
  0x1c   :  { %p897_p0 = por %p896_p13, %p895_p12 }
  0x1e   :  { %p898_p1 = pnand %p897_p0, %p891_p11 }
  0x20   :  { %901 = shalt.err (!%p898_p1)
}
  0x21   :  { %32 = dma.hbm_to_vmem [thread:$0]  %s998_s1, 1024, %s27_s24, [#allocation5], %s907_s19, %s907_s19, %s908_s20  }
  0x22   :  { %902 = dma.done.wait [#allocation3], 2048  }
  0x23   :  { %903 = vsyncadd [#allocation3], 4294965248 }
  0x24   :  { %904 = dma.done.wait [#allocation5], 1024  }
  0x25   :  { %905 = vsyncadd [#allocation5], 4294966272  ;;  %v834_v0 = vld [vmem:[#allocation4] sm:$0xff]   ;;  %v835_v1 = vld [vmem:[#allocation4 + $0x8] sm:$0xff]  }
  0x26   :  { %766 = vmatprep.subr.bf16.mxu0 %v834_v0  ;;  %814 = vmatprep.subr.bf16.mxu1 %v834_v0  ;;  %v836_v2 = vld [vmem:[#allocation4 + $0x10] sm:$0xff]   ;;  %v837_v3 = vld [vmem:[#allocation4 + $0x18] sm:$0xff]   ;;  %v842_v4 = vld [vmem:[#allocation2] sm:$0xff]  }
  0x27   :  { %767 = vmatpush3.bf16.msra.mxu0 %v834_v0  ;;  %822 = vmatpush3.bf16.msra.mxu1 %v834_v0  ;;  %v843_v5 = vld [vmem:[#allocation2 + $0x40] sm:$0xff]   ;;  %v839_v7 = vld [vmem:[#allocation4 + $0x28] sm:$0xff]   ;;  %v840_v8 = vld [vmem:[#allocation4 + $0x30] sm:$0xff]  }
  0x28   :  { %768 = vmatprep.subr.bf16.mxu0 %v835_v1  ;;  %815 = vmatprep.subr.bf16.mxu1 %v835_v1  ;;  %v838_v6 = vld [vmem:[#allocation4 + $0x20] sm:$0xff]   ;;  %v841_v9 = vld [vmem:[#allocation4 + $0x38] sm:$0xff]   ;;  %v844_v10 = vld [vmem:[#allocation2 + $0x8] sm:$0xff]  }
  0x29   :  { %782 = vmatprep.mubr.bf16.mxu0 %v842_v4  ;;  %798 = vmatprep.mubr.bf16.mxu1 %v843_v5  ;;  %v845_v11 = vld [vmem:[#allocation2 + $0x48] sm:$0xff]   ;;  %v846_v12 = vld [vmem:[#allocation2 + $0x10] sm:$0xff]   ;;  %v848_v14 = vld [vmem:[#allocation2 + $0x18] sm:$0xff]  }
  0x2a   :  { %v847_v13 = vld [vmem:[#allocation2 + $0x50] sm:$0xff]   ;;  %v849_v15 = vld [vmem:[#allocation2 + $0x58] sm:$0xff]   ;;  %v850_v16 = vld [vmem:[#allocation2 + $0x20] sm:$0xff]  }
  0x2b   :  { %769 = vmatpush3.bf16.msra.mxu0 %v835_v1  ;;  %823 = vmatpush3.bf16.msra.mxu1 %v835_v1  ;;  %v851_v17 = vld [vmem:[#allocation2 + $0x60] sm:$0xff]   ;;  %v852_v18 = vld [vmem:[#allocation2 + $0x28] sm:$0xff]   ;;  %v854_v20 = vld [vmem:[#allocation2 + $0x30] sm:$0xff]  }
  0x2c   :  { %770 = vmatprep.subr.bf16.mxu0 %v836_v2  ;;  %816 = vmatprep.subr.bf16.mxu1 %v836_v2  ;;  %v853_v19 = vld [vmem:[#allocation2 + $0x68] sm:$0xff]   ;;  %v855_v21 = vld [vmem:[#allocation2 + $0x70] sm:$0xff]   ;;  %v856_v22 = vld [vmem:[#allocation2 + $0x38] sm:$0xff]  }
  0x2d   :  { %v857_v23 = vld [vmem:[#allocation2 + $0x78] sm:$0xff]  }
  0x2f   :  { %771 = vmatpush3.bf16.msra.mxu0 %v836_v2  ;;  %824 = vmatpush3.bf16.msra.mxu1 %v836_v2 }
  0x30   :  { %772 = vmatprep.subr.bf16.mxu0 %v837_v3  ;;  %817 = vmatprep.subr.bf16.mxu1 %v837_v3 }
  0x33   :  { %773 = vmatpush3.bf16.msra.mxu0 %v837_v3  ;;  %825 = vmatpush3.bf16.msra.mxu1 %v837_v3 }
  0x34   :  { %774 = vmatprep.subr.bf16.mxu0 %v838_v6  ;;  %818 = vmatprep.subr.bf16.mxu1 %v838_v6 }
  0x37   :  { %775 = vmatpush3.bf16.msra.mxu0 %v838_v6  ;;  %826 = vmatpush3.bf16.msra.mxu1 %v838_v6 }
  0x38   :  { %776 = vmatprep.subr.bf16.mxu0 %v839_v7  ;;  %819 = vmatprep.subr.bf16.mxu1 %v839_v7 }
  0x3b   :  { %777 = vmatpush3.bf16.msra.mxu0 %v839_v7  ;;  %827 = vmatpush3.bf16.msra.mxu1 %v839_v7 }
  0x3c   :  { %778 = vmatprep.subr.bf16.mxu0 %v840_v8  ;;  %820 = vmatprep.subr.bf16.mxu1 %v840_v8 }
  0x3f   :  { %779 = vmatpush3.bf16.msra.mxu0 %v840_v8  ;;  %828 = vmatpush3.bf16.msra.mxu1 %v840_v8 }
  0x40   :  { %780 = vmatprep.subr.bf16.mxu0 %v841_v9  ;;  %821 = vmatprep.subr.bf16.mxu1 %v841_v9 }
  0x43   :  { %781 = vmatpush3.bf16.msra.mxu0 %v841_v9  ;;  %829 = vmatpush3.bf16.msra.mxu1 %v841_v9 }
  0x46   :  { %783 = vmatmul.mubr.bf16.vlgmr.msra.gmra.mrb[0].mxu0 %v844_v10  ;;  %799 = vmatmul.mubr.bf16.vlgmr.msra.gmra.mrb[0].mxu1 %v845_v11 }
  0x47   :  { %786 = vmatprep.mubr.bf16.mxu0 %v846_v12  ;;  %802 = vmatprep.mubr.bf16.mxu1 %v847_v13 }
  0x4e   :  { %787 = vmatmul.mubr.bf16.gmra.mrb[4].mxu0 %v848_v14  ;;  %803 = vmatmul.mubr.bf16.gmra.mrb[4].mxu1 %v849_v15 }
  0x4f   :  { %790 = vmatprep.mubr.bf16.mxu0 %v850_v16  ;;  %806 = vmatprep.mubr.bf16.mxu1 %v851_v17 }
  0x56   :  { %791 = vmatmul.mubr.bf16.gmra.mrb[8].mxu0 %v852_v18  ;;  %807 = vmatmul.mubr.bf16.gmra.mrb[8].mxu1 %v853_v19 }
  0x57   :  { %794 = vmatprep.mubr.bf16.mxu0 %v854_v20  ;;  %810 = vmatprep.mubr.bf16.mxu1 %v855_v21 }
  0x5e   :  { %795 = vmatmul.mubr.bf16.gmra.mrb[12].mxu0 %v856_v22  ;;  %811 = vmatmul.mubr.bf16.gmra.mrb[12].mxu1 %v857_v23 }
 0x119   :  { %v784_v24 = vpop.f32.mrb[0].mxu0  ;;  %v800_v25 = vpop.f32.mrb[0].mxu1 }
 0x11a   :  { %v266_v26 = vpop.f32.mrb[1].mxu0  ;;  %v330_v27 = vpop.f32.mrb[1].mxu1 }
 0x11b   :  { %v785_v28 = vpop.f32.mrb[2].mxu0  ;;  %v801_v29 = vpop.f32.mrb[2].mxu1 }
 0x11c   :  { %v655_v30 = vpack.c.bf16 %v785_v28, %v784_v24  ;;  %v695_v31 = vpack.c.bf16 %v801_v29, %v800_v25  ;;  %v269_v32 = vpop.f32.mrb[3].mxu0  ;;  %v333_v33 = vpop.f32.mrb[3].mxu1 }
 0x11d   :  { %v650_v34 = vpack.c.bf16 %v269_v32, %v266_v26  ;;  %v690_v35 = vpack.c.bf16 %v333_v33, %v330_v27 }
 0x11e   :  { %727 = vst [vmem:[%s999_s2 + $0x8] sm:$0xff] %v655_v30   ;;  %735 = vst [vmem:[%s999_s2 + $0x48] sm:$0xff] %v695_v31  }
 0x11f   :  { %651 = vst [vmem:[%s999_s2] sm:$0xff] %v650_v34   ;;  %734 = vst [vmem:[%s999_s2 + $0x40] sm:$0xff] %v690_v35  }
 0x121   :  { %v788_v36 = vpop.f32.mrb[4].mxu0  ;;  %v804_v37 = vpop.f32.mrb[4].mxu1 }
 0x122   :  { %v282_v38 = vpop.f32.mrb[5].mxu0  ;;  %v346_v39 = vpop.f32.mrb[5].mxu1 }
 0x123   :  { %v789_v40 = vpop.f32.mrb[6].mxu0  ;;  %v805_v41 = vpop.f32.mrb[6].mxu1 }
 0x124   :  { %v665_v42 = vpack.c.bf16 %v789_v40, %v788_v36  ;;  %v705_v43 = vpack.c.bf16 %v805_v41, %v804_v37  ;;  %v285_v44 = vpop.f32.mrb[7].mxu0  ;;  %v349_v45 = vpop.f32.mrb[7].mxu1 }
 0x125   :  { %v660_v46 = vpack.c.bf16 %v285_v44, %v282_v38  ;;  %v700_v47 = vpack.c.bf16 %v349_v45, %v346_v39 }
 0x126   :  { %729 = vst [vmem:[%s999_s2 + $0x18] sm:$0xff] %v665_v42   ;;  %737 = vst [vmem:[%s999_s2 + $0x58] sm:$0xff] %v705_v43  }
 0x127   :  { %728 = vst [vmem:[%s999_s2 + $0x10] sm:$0xff] %v660_v46   ;;  %736 = vst [vmem:[%s999_s2 + $0x50] sm:$0xff] %v700_v47  }
 0x129   :  { %v792_v48 = vpop.f32.mrb[8].mxu0  ;;  %v808_v49 = vpop.f32.mrb[8].mxu1 }
 0x12a   :  { %v298_v50 = vpop.f32.mrb[9].mxu0  ;;  %v362_v51 = vpop.f32.mrb[9].mxu1 }
 0x12b   :  { %v793_v52 = vpop.f32.mrb[10].mxu0  ;;  %v809_v53 = vpop.f32.mrb[10].mxu1 }
 0x12c   :  { %v675_v54 = vpack.c.bf16 %v793_v52, %v792_v48  ;;  %v715_v55 = vpack.c.bf16 %v809_v53, %v808_v49  ;;  %v301_v56 = vpop.f32.mrb[11].mxu0  ;;  %v365_v57 = vpop.f32.mrb[11].mxu1 }
 0x12d   :  { %v670_v58 = vpack.c.bf16 %v301_v56, %v298_v50  ;;  %v710_v59 = vpack.c.bf16 %v365_v57, %v362_v51 }
 0x12e   :  { %731 = vst [vmem:[%s999_s2 + $0x28] sm:$0xff] %v675_v54   ;;  %739 = vst [vmem:[%s999_s2 + $0x68] sm:$0xff] %v715_v55  }
 0x12f   :  { %730 = vst [vmem:[%s999_s2 + $0x20] sm:$0xff] %v670_v58   ;;  %738 = vst [vmem:[%s999_s2 + $0x60] sm:$0xff] %v710_v59  }
 0x131   :  { %v796_v60 = vpop.f32.mrb[12].mxu0  ;;  %v812_v61 = vpop.f32.mrb[12].mxu1 }
 0x132   :  { %v314_v62 = vpop.f32.mrb[13].mxu0  ;;  %v378_v63 = vpop.f32.mrb[13].mxu1 }
 0x133   :  { %v797_v0 = vpop.f32.mrb[14].mxu0  ;;  %v813_v1 = vpop.f32.mrb[14].mxu1 }
 0x134   :  { %v685_v2 = vpack.c.bf16 %v797_v0, %v796_v60  ;;  %v725_v3 = vpack.c.bf16 %v813_v1, %v812_v61  ;;  %v317_v4 = vpop.f32.mrb[15].mxu0  ;;  %v381_v5 = vpop.f32.mrb[15].mxu1 }
 0x135   :  { %v680_v6 = vpack.c.bf16 %v317_v4, %v314_v62  ;;  %v720_v7 = vpack.c.bf16 %v381_v5, %v378_v63 }
 0x136   :  { %733 = vst [vmem:[%s999_s2 + $0x38] sm:$0xff] %v685_v2   ;;  %741 = vst [vmem:[%s999_s2 + $0x78] sm:$0xff] %v725_v3  }
 0x137   :  { %732 = vst [vmem:[%s999_s2 + $0x30] sm:$0xff] %v680_v6   ;;  %740 = vst [vmem:[%s999_s2 + $0x70] sm:$0xff] %v720_v7  }
 0x138   :  { %557 = vsyncpa [#allocation3], 1 }
 0x139   :  { %558 = vsyncpa [#allocation5], 1 }

// kernel: gcn_layer.4
= control target key start
LH: loop header
LB: loop body
LE: loop exit
PB: predicated region body
PF: predicated region fallthrough
CT: control target
= control target key end

     0   :  { %s1545_s0 = inlined_call_operand.vmem [shape: bf16[256,256], index: 0, kind: input, shape index: {}]   ;;  %s1546_s1 = inlined_call_operand.vmem [shape: bf16[256,128], index: 1, kind: input, shape index: {}]   ;;  %s1547_s2 = inlined_call_operand.hbm [shape: f32[256,128], index: 2, kind: output, shape index: {0}]   ;;  %s1548_s3 = inlined_call_operand.vmem [shape: f32[1,8,128], index: 3, kind: output, shape index: {1}]  }
   0x1   :  { %v1077_v0 = vld [vmem:[%s1546_s1 + $0x40] sm:$0xff]   ;;  %v1079_v2 = vld [vmem:[%s1546_s1 + $0x48] sm:$0xff]   ;;  %v1081_v4 = vld [vmem:[%s1546_s1 + $0x50] sm:$0xff]  }
   0x2   :  { %v1078_v1 = vld [vmem:[%s1546_s1] sm:$0xff]   ;;  %946 = vmatprep.subr.bf16.mxu0 %v1077_v0  ;;  %1058 = vmatprep.subr.bf16.mxu1 %v1077_v0  ;;  %v1080_v3 = vld [vmem:[%s1546_s1 + $0x8] sm:$0xff]   ;;  %v1082_v5 = vld [vmem:[%s1546_s1 + $0x10] sm:$0xff]  }
   0x3   :  { %947 = vmatpush3.bf16.msra.mxu0 %v1078_v1  ;;  %1066 = vmatpush3.bf16.msra.mxu1 %v1078_v1  ;;  %v1083_v6 = vld [vmem:[%s1546_s1 + $0x58] sm:$0xff]   ;;  %v1085_v8 = vld [vmem:[%s1546_s1 + $0x60] sm:$0xff]   ;;  %v1087_v10 = vld [vmem:[%s1546_s1 + $0x68] sm:$0xff]  }
   0x4   :  { %948 = vmatprep.subr.bf16.mxu0 %v1079_v2  ;;  %1059 = vmatprep.subr.bf16.mxu1 %v1079_v2  ;;  %v1084_v7 = vld [vmem:[%s1546_s1 + $0x18] sm:$0xff]   ;;  %v1086_v9 = vld [vmem:[%s1546_s1 + $0x20] sm:$0xff]   ;;  %v1088_v12 = vld [vmem:[%s1546_s1 + $0x28] sm:$0xff]  }
   0x5   :  { %v1095_v11 = vld [vmem:[%s1545_s0 + $0x4] ss:$8 sps:$4 sm:$0xff]   ;;  %v1089_v13 = vld [vmem:[%s1546_s1 + $0x70] sm:$0xff]   ;;  %v1091_v16 = vld [vmem:[%s1546_s1 + $0x78] sm:$0xff]  }
   0x6   :  { %440 = vmatprep.mubr.bf16.mxu0 %v1095_v11  ;;  %v1107_v14 = vld [vmem:[%s1545_s0 + $0x84] ss:$8 sps:$4 sm:$0xff]   ;;  %v1090_v15 = vld [vmem:[%s1546_s1 + $0x30] sm:$0xff]   ;;  %v1092_v17 = vld [vmem:[%s1546_s1 + $0x38] sm:$0xff]  }
   0x7   :  { %949 = vmatpush3.bf16.msra.mxu0 %v1080_v3  ;;  %1067 = vmatpush3.bf16.msra.mxu1 %v1080_v3  ;;  %v1093_v18 = vld [vmem:[%s1545_s0] ss:$8 sps:$4 sm:$0xff]   ;;  %v1096_v19 = vld [vmem:[%s1545_s0 + $0x14] ss:$8 sps:$4 sm:$0xff]  }
   0x8   :  { %950 = vmatprep.subr.bf16.mxu0 %v1081_v4  ;;  %1060 = vmatprep.subr.bf16.mxu1 %v1081_v4  ;;  %v1105_v20 = vld [vmem:[%s1545_s0 + $0x80] ss:$8 sps:$4 sm:$0xff]   ;;  %v1111_v21 = vld [vmem:[%s1545_s0 + $0x94] ss:$8 sps:$4 sm:$0xff]  }
   0x9   :  { %504 = vmatprep.mubr.bf16.mxu1 %v1107_v14 }
   0xb   :  { %951 = vmatpush3.bf16.msra.mxu0 %v1082_v5  ;;  %1068 = vmatpush3.bf16.msra.mxu1 %v1082_v5 }
   0xc   :  { %952 = vmatprep.subr.bf16.mxu0 %v1083_v6  ;;  %1061 = vmatprep.subr.bf16.mxu1 %v1083_v6 }
   0xf   :  { %953 = vmatpush3.bf16.msra.mxu0 %v1084_v7  ;;  %1069 = vmatpush3.bf16.msra.mxu1 %v1084_v7 }
  0x10   :  { %954 = vmatprep.subr.bf16.mxu0 %v1085_v8  ;;  %1062 = vmatprep.subr.bf16.mxu1 %v1085_v8 }
  0x13   :  { %955 = vmatpush3.bf16.msra.mxu0 %v1086_v9  ;;  %1070 = vmatpush3.bf16.msra.mxu1 %v1086_v9 }
  0x14   :  { %956 = vmatprep.subr.bf16.mxu0 %v1087_v10  ;;  %1063 = vmatprep.subr.bf16.mxu1 %v1087_v10 }
  0x17   :  { %957 = vmatpush3.bf16.msra.mxu0 %v1088_v12  ;;  %1071 = vmatpush3.bf16.msra.mxu1 %v1088_v12 }
  0x18   :  { %958 = vmatprep.subr.bf16.mxu0 %v1089_v13  ;;  %1064 = vmatprep.subr.bf16.mxu1 %v1089_v13 }
  0x1b   :  { %959 = vmatpush3.bf16.msra.mxu0 %v1090_v15  ;;  %1072 = vmatpush3.bf16.msra.mxu1 %v1090_v15 }
  0x1c   :  { %960 = vmatprep.subr.bf16.mxu0 %v1091_v16  ;;  %1065 = vmatprep.subr.bf16.mxu1 %v1091_v16 }
  0x1f   :  { %961 = vmatpush3.bf16.msra.mxu0 %v1092_v17  ;;  %1073 = vmatpush3.bf16.msra.mxu1 %v1092_v17 }
  0x22   :  { %441 = vmatmul.mubr.bf16.vlgmr.msra.gmra.mrb[0].mxu0 %v1093_v18  ;;  %505 = vmatmul.mubr.bf16.vlgmr.msra.gmra.mrb[0].mxu1 %v1105_v20 }
  0x23   :  { %448 = vmatprep.mubr.bf16.mxu0 %v1096_v19  ;;  %512 = vmatprep.mubr.bf16.mxu1 %v1111_v21 }
  0x24   :  { %9 = vsyncpa [#allocation4], 0  ;;  %v1098_v22 = vld [vmem:[%s1545_s0 + $0x10] ss:$8 sps:$4 sm:$0xff]   ;;  %v1099_v23 = vld [vmem:[%s1545_s0 + $0x24] ss:$8 sps:$4 sm:$0xff]  }
  0x25   :  { %v1113_v24 = vld [vmem:[%s1545_s0 + $0x90] ss:$8 sps:$4 sm:$0xff]   ;;  %v1117_v25 = vld [vmem:[%s1545_s0 + $0xa4] ss:$8 sps:$4 sm:$0xff]   ;;  %v1101_v26 = vld [vmem:[%s1545_s0 + $0x20] ss:$8 sps:$4 sm:$0xff]  }
  0x26   :  { %v1102_v27 = vld [vmem:[%s1545_s0 + $0x34] ss:$8 sps:$4 sm:$0xff]   ;;  %v1119_v28 = vld [vmem:[%s1545_s0 + $0xa0] ss:$8 sps:$4 sm:$0xff]   ;;  %v1104_v30 = vld [vmem:[%s1545_s0 + $0x30] ss:$8 sps:$4 sm:$0xff]  }
  0x27   :  { %v1123_v29 = vld [vmem:[%s1545_s0 + $0xb4] ss:$8 sps:$4 sm:$0xff]   ;;  %v1108_v31 = vld [vmem:[%s1545_s0 + $0x44] ss:$8 sps:$4 sm:$0xff]   ;;  %v1125_v32 = vld [vmem:[%s1545_s0 + $0xb0] ss:$8 sps:$4 sm:$0xff]  }
  0x28   :  { %v1129_v33 = vld [vmem:[%s1545_s0 + $0xc4] ss:$8 sps:$4 sm:$0xff]   ;;  %v1110_v34 = vld [vmem:[%s1545_s0 + $0x40] ss:$8 sps:$4 sm:$0xff]   ;;  %v1114_v35 = vld [vmem:[%s1545_s0 + $0x54] ss:$8 sps:$4 sm:$0xff]  }
  0x29   :  { %v1131_v36 = vld [vmem:[%s1545_s0 + $0xc0] ss:$8 sps:$4 sm:$0xff]   ;;  %v1132_v37 = vld [vmem:[%s1545_s0 + $0xd4] ss:$8 sps:$4 sm:$0xff]   ;;  %v1116_v38 = vld [vmem:[%s1545_s0 + $0x50] ss:$8 sps:$4 sm:$0xff]  }
  0x2a   :  { %449 = vmatmul.mubr.bf16.gmra.mrb[4].mxu0 %v1098_v22  ;;  %513 = vmatmul.mubr.bf16.gmra.mrb[4].mxu1 %v1113_v24  ;;  %v1120_v39 = vld [vmem:[%s1545_s0 + $0x64] ss:$8 sps:$4 sm:$0xff]   ;;  %v1134_v40 = vld [vmem:[%s1545_s0 + $0xd0] ss:$8 sps:$4 sm:$0xff]   ;;  %v1122_v42 = vld [vmem:[%s1545_s0 + $0x60] ss:$8 sps:$4 sm:$0xff]  }
  0x2b   :  { %456 = vmatprep.mubr.bf16.mxu0 %v1099_v23  ;;  %520 = vmatprep.mubr.bf16.mxu1 %v1117_v25  ;;  %v1135_v41 = vld [vmem:[%s1545_s0 + $0xe4] ss:$8 sps:$4 sm:$0xff]   ;;  %v1126_v43 = vld [vmem:[%s1545_s0 + $0x74] ss:$8 sps:$4 sm:$0xff]   ;;  %v1137_v44 = vld [vmem:[%s1545_s0 + $0xe0] ss:$8 sps:$4 sm:$0xff]  }
  0x2c   :  { %v1138_v45 = vld [vmem:[%s1545_s0 + $0xf4] ss:$8 sps:$4 sm:$0xff]   ;;  %v1128_v46 = vld [vmem:[%s1545_s0 + $0x70] ss:$8 sps:$4 sm:$0xff]  }
  0x2d   :  { %v1140_v47 = vld [vmem:[%s1545_s0 + $0xf0] ss:$8 sps:$4 sm:$0xff]   ;;  %s1165_s0 = smov [#allocation3]  }
  0x2e   :  { %s881_s25 = sshll.u32 %s1165_s0, 4  ;;  %s882_s25 = int_to_ptr.vmem [resolvable:$true] %s881_s25 }
  0x2f   :  { %s1141_s26 = scalar_lea.vmem %s882_s25, 4096  ;;  %p1146_p1 = scmp.lt.s32.totalorder %s882_s25, %s882_s25 }
  0x30   :  { %p1142_p0 = scmp.ne.s32.totalorder %s882_s25, %s1141_s26  ;;  %p1147_p2 = scmp.lt.s32.totalorder %s1141_s26, %s1141_s26 }
  0x32   :  { %457 = vmatmul.mubr.bf16.gmra.mrb[8].mxu0 %v1101_v26  ;;  %521 = vmatmul.mubr.bf16.gmra.mrb[8].mxu1 %v1119_v28  ;;  %p1148_p3 = por %p1147_p2, %p1146_p1 }
  0x33   :  { %464 = vmatprep.mubr.bf16.mxu0 %v1102_v27  ;;  %528 = vmatprep.mubr.bf16.mxu1 %v1123_v29 }
  0x34   :  { %p1149_p4 = pnand %p1148_p3, %p1142_p0 }
  0x3a   :  { %465 = vmatmul.mubr.bf16.gmra.mrb[12].mxu0 %v1104_v30  ;;  %529 = vmatmul.mubr.bf16.gmra.mrb[12].mxu1 %v1125_v32 }
  0x3b   :  { %472 = vmatprep.mubr.bf16.mxu0 %v1108_v31  ;;  %536 = vmatprep.mubr.bf16.mxu1 %v1129_v33 }
  0x42   :  { %473 = vmatmul.mubr.bf16.gmra.mrb[16].mxu0 %v1110_v34  ;;  %537 = vmatmul.mubr.bf16.gmra.mrb[16].mxu1 %v1131_v36 }
  0x43   :  { %480 = vmatprep.mubr.bf16.mxu0 %v1114_v35  ;;  %544 = vmatprep.mubr.bf16.mxu1 %v1132_v37 }
  0x4a   :  { %481 = vmatmul.mubr.bf16.gmra.mrb[20].mxu0 %v1116_v38  ;;  %545 = vmatmul.mubr.bf16.gmra.mrb[20].mxu1 %v1134_v40 }
  0x4b   :  { %488 = vmatprep.mubr.bf16.mxu0 %v1120_v39  ;;  %552 = vmatprep.mubr.bf16.mxu1 %v1135_v41 }
  0x52   :  { %489 = vmatmul.mubr.bf16.gmra.mrb[24].mxu0 %v1122_v42  ;;  %553 = vmatmul.mubr.bf16.gmra.mrb[24].mxu1 %v1137_v44 }
  0x53   :  { %496 = vmatprep.mubr.bf16.mxu0 %v1126_v43  ;;  %560 = vmatprep.mubr.bf16.mxu1 %v1138_v45 }
  0x5a   :  { %497 = vmatmul.mubr.bf16.gmra.mrb[28].mxu0 %v1128_v46  ;;  %561 = vmatmul.mubr.bf16.gmra.mrb[28].mxu1 %v1140_v47 }
  0xf5   :  { %v962_v48 = vpop.f32.mrb[0].mxu0  ;;  %v1010_v50 = vpop.f32.mrb[0].mxu1 }
  0xf6   :  { %v963_v49 = vpop.f32.mrb[1].mxu0  ;;  %v1011_v53 = vpop.f32.mrb[1].mxu1 }
  0xf7   :  { %v1332_v51 = vadd.f32 %v963_v49, %v962_v48  ;;  %v965_v52 = vpop.f32.mrb[2].mxu0  ;;  %v1334_v55 = vadd.f32 %v1011_v53, %v1010_v50  ;;  %v1013_v56 = vpop.f32.mrb[2].mxu1 }
  0xf8   :  { %v966_v54 = vpop.f32.mrb[3].mxu0  ;;  %v1014_v58 = vpop.f32.mrb[3].mxu1 }
  0xf9   :  { %668 = vst [vmem:[#allocation3] sm:$0xff] %v1332_v51  ;;  %v1337_v57 = vadd.f32 %v966_v54, %v965_v52  ;;  %684 = vst [vmem:[#allocation3 + $0x80] sm:$0xff] %v1334_v55  ;;  %v1340_v59 = vadd.f32 %v1014_v58, %v1013_v56 }
  0xfb   :  { %669 = vst [vmem:[#allocation3 + $0x8] sm:$0xff] %v1337_v57  ;;  %685 = vst [vmem:[#allocation3 + $0x88] sm:$0xff] %v1340_v59  ;;  %v732_v17 = vadd.f32 %v1337_v57, %v1332_v51 }
  0xfd   :  { %v968_v60 = vpop.f32.mrb[4].mxu0  ;;  %v1016_v62 = vpop.f32.mrb[4].mxu1 }
  0xfe   :  { %v969_v61 = vpop.f32.mrb[5].mxu0  ;;  %v1017_v1 = vpop.f32.mrb[5].mxu1 }
  0xff   :  { %v1344_v63 = vadd.f32 %v969_v61, %v968_v60  ;;  %v971_v0 = vpop.f32.mrb[6].mxu0  ;;  %v1346_v3 = vadd.f32 %v1017_v1, %v1016_v62  ;;  %v1019_v4 = vpop.f32.mrb[6].mxu1 }
 0x100   :  { %v972_v2 = vpop.f32.mrb[7].mxu0  ;;  %v1020_v6 = vpop.f32.mrb[7].mxu1 }
 0x101   :  { %670 = vst [vmem:[#allocation3 + $0x10] sm:$0xff] %v1344_v63  ;;  %v1349_v5 = vadd.f32 %v972_v2, %v971_v0  ;;  %686 = vst [vmem:[#allocation3 + $0x90] sm:$0xff] %v1346_v3  ;;  %v1352_v7 = vadd.f32 %v1020_v6, %v1019_v4  ;;  %v733_v21 = vadd.f32 %v1344_v63, %v732_v17 }
 0x103   :  { %671 = vst [vmem:[#allocation3 + $0x18] sm:$0xff] %v1349_v5  ;;  %687 = vst [vmem:[#allocation3 + $0x98] sm:$0xff] %v1352_v7  ;;  %v734_v25 = vadd.f32 %v1349_v5, %v733_v21 }
 0x105   :  { %v974_v8 = vpop.f32.mrb[8].mxu0  ;;  %v1022_v10 = vpop.f32.mrb[8].mxu1 }
 0x106   :  { %v975_v9 = vpop.f32.mrb[9].mxu0  ;;  %v1023_v13 = vpop.f32.mrb[9].mxu1 }
 0x107   :  { %v1356_v11 = vadd.f32 %v975_v9, %v974_v8  ;;  %v977_v12 = vpop.f32.mrb[10].mxu0  ;;  %v1358_v15 = vadd.f32 %v1023_v13, %v1022_v10  ;;  %v1025_v16 = vpop.f32.mrb[10].mxu1 }
 0x108   :  { %v978_v14 = vpop.f32.mrb[11].mxu0  ;;  %v1026_v19 = vpop.f32.mrb[11].mxu1 }
 0x109   :  { %672 = vst [vmem:[#allocation3 + $0x20] sm:$0xff] %v1356_v11  ;;  %v1363_v18 = vadd.f32 %v978_v14, %v977_v12  ;;  %688 = vst [vmem:[#allocation3 + $0xa0] sm:$0xff] %v1358_v15  ;;  %v1366_v20 = vadd.f32 %v1026_v19, %v1025_v16  ;;  %v735_v32 = vadd.f32 %v1356_v11, %v734_v25 }
 0x10b   :  { %673 = vst [vmem:[#allocation3 + $0x28] sm:$0xff] %v1363_v18  ;;  %689 = vst [vmem:[#allocation3 + $0xa8] sm:$0xff] %v1366_v20  ;;  %v736_v36 = vadd.f32 %v1363_v18, %v735_v32 }
 0x10d   :  { %v980_v22 = vpop.f32.mrb[12].mxu0  ;;  %v1028_v24 = vpop.f32.mrb[12].mxu1 }
 0x10e   :  { %v981_v23 = vpop.f32.mrb[13].mxu0  ;;  %v1029_v28 = vpop.f32.mrb[13].mxu1 }
 0x10f   :  { %v1372_v26 = vadd.f32 %v981_v23, %v980_v22  ;;  %v983_v27 = vpop.f32.mrb[14].mxu0  ;;  %v1374_v30 = vadd.f32 %v1029_v28, %v1028_v24  ;;  %v1031_v31 = vpop.f32.mrb[14].mxu1 }
 0x110   :  { %v984_v29 = vpop.f32.mrb[15].mxu0  ;;  %v1032_v34 = vpop.f32.mrb[15].mxu1 }
 0x111   :  { %674 = vst [vmem:[#allocation3 + $0x30] sm:$0xff] %v1372_v26  ;;  %v1378_v33 = vadd.f32 %v984_v29, %v983_v27  ;;  %690 = vst [vmem:[#allocation3 + $0xb0] sm:$0xff] %v1374_v30  ;;  %v1381_v35 = vadd.f32 %v1032_v34, %v1031_v31  ;;  %v737_v40 = vadd.f32 %v1372_v26, %v736_v36 }
 0x113   :  { %675 = vst [vmem:[#allocation3 + $0x38] sm:$0xff] %v1378_v33  ;;  %691 = vst [vmem:[#allocation3 + $0xb8] sm:$0xff] %v1381_v35  ;;  %v738_v50 = vadd.f32 %v1378_v33, %v737_v40 }
 0x115   :  { %v986_v37 = vpop.f32.mrb[16].mxu0  ;;  %v1034_v39 = vpop.f32.mrb[16].mxu1 }
 0x116   :  { %v987_v38 = vpop.f32.mrb[17].mxu0  ;;  %v1035_v43 = vpop.f32.mrb[17].mxu1 }
 0x117   :  { %v1387_v41 = vadd.f32 %v987_v38, %v986_v37  ;;  %v989_v42 = vpop.f32.mrb[18].mxu0  ;;  %v1389_v45 = vadd.f32 %v1035_v43, %v1034_v39  ;;  %v1037_v46 = vpop.f32.mrb[18].mxu1 }
 0x118   :  { %v990_v44 = vpop.f32.mrb[19].mxu0  ;;  %v1038_v48 = vpop.f32.mrb[19].mxu1 }
 0x119   :  { %676 = vst [vmem:[#allocation3 + $0x40] sm:$0xff] %v1387_v41  ;;  %v1392_v47 = vadd.f32 %v990_v44, %v989_v42  ;;  %692 = vst [vmem:[#allocation3 + $0xc0] sm:$0xff] %v1389_v45  ;;  %v1395_v49 = vadd.f32 %v1038_v48, %v1037_v46  ;;  %v739_v52 = vadd.f32 %v1387_v41, %v738_v50 }
 0x11b   :  { %677 = vst [vmem:[#allocation3 + $0x48] sm:$0xff] %v1392_v47  ;;  %693 = vst [vmem:[#allocation3 + $0xc8] sm:$0xff] %v1395_v49  ;;  %v740_v2 = vadd.f32 %v1392_v47, %v739_v52 }
 0x11d   :  { %v992_v53 = vpop.f32.mrb[20].mxu0  ;;  %v1040_v56 = vpop.f32.mrb[20].mxu1 }
 0x11e   :  { %v993_v54 = vpop.f32.mrb[21].mxu0  ;;  %v1041_v61 = vpop.f32.mrb[21].mxu1 }
 0x11f   :  { %v1401_v58 = vadd.f32 %v993_v54, %v992_v53  ;;  %v995_v60 = vpop.f32.mrb[22].mxu0  ;;  %v1403_v0 = vadd.f32 %v1041_v61, %v1040_v56  ;;  %v1043_v1 = vpop.f32.mrb[22].mxu1 }
 0x120   :  { %v996_v62 = vpop.f32.mrb[23].mxu0  ;;  %v1044_v6 = vpop.f32.mrb[23].mxu1 }
 0x121   :  { %678 = vst [vmem:[#allocation3 + $0x50] sm:$0xff] %v1401_v58  ;;  %v1407_v4 = vadd.f32 %v996_v62, %v995_v60  ;;  %694 = vst [vmem:[#allocation3 + $0xd0] sm:$0xff] %v1403_v0  ;;  %v1410_v8 = vadd.f32 %v1044_v6, %v1043_v1  ;;  %v741_v9 = vadd.f32 %v1401_v58, %v740_v2 }
 0x123   :  { %679 = vst [vmem:[#allocation3 + $0x58] sm:$0xff] %v1407_v4  ;;  %695 = vst [vmem:[#allocation3 + $0xd8] sm:$0xff] %v1410_v8  ;;  %v742_v14 = vadd.f32 %v1407_v4, %v741_v9 }
 0x125   :  { %v998_v10 = vpop.f32.mrb[24].mxu0  ;;  %v1046_v13 = vpop.f32.mrb[24].mxu1 }
 0x126   :  { %v999_v12 = vpop.f32.mrb[25].mxu0  ;;  %v1047_v19 = vpop.f32.mrb[25].mxu1 }
 0x127   :  { %v1416_v16 = vadd.f32 %v999_v12, %v998_v10  ;;  %v1001_v17 = vpop.f32.mrb[26].mxu0  ;;  %v1418_v22 = vadd.f32 %v1047_v19, %v1046_v13  ;;  %v1049_v23 = vpop.f32.mrb[26].mxu1 }
 0x128   :  { %v1002_v21 = vpop.f32.mrb[27].mxu0  ;;  %v1050_v27 = vpop.f32.mrb[27].mxu1 }
 0x129   :  { %680 = vst [vmem:[#allocation3 + $0x60] sm:$0xff] %v1416_v16  ;;  %v743_v24 = vadd.f32 %v1416_v16, %v742_v14  ;;  %v1422_v25 = vadd.f32 %v1002_v21, %v1001_v17  ;;  %696 = vst [vmem:[#allocation3 + $0xe0] sm:$0xff] %v1418_v22  ;;  %v1425_v28 = vadd.f32 %v1050_v27, %v1049_v23 }
 0x12b   :  { %681 = vst [vmem:[#allocation3 + $0x68] sm:$0xff] %v1422_v25  ;;  %v744_v29 = vadd.f32 %v1422_v25, %v743_v24  ;;  %697 = vst [vmem:[#allocation3 + $0xe8] sm:$0xff] %v1425_v28 }
 0x12d   :  { %v1004_v31 = vpop.f32.mrb[28].mxu0  ;;  %v1052_v34 = vpop.f32.mrb[28].mxu1 }
 0x12e   :  { %v1005_v32 = vpop.f32.mrb[29].mxu0  ;;  %v1053_v38 = vpop.f32.mrb[29].mxu1 }
 0x12f   :  { %v1430_v36 = vadd.f32 %v1005_v32, %v1004_v31  ;;  %v1007_v37 = vpop.f32.mrb[30].mxu0  ;;  %v1432_v40 = vadd.f32 %v1053_v38, %v1052_v34  ;;  %v1055_v42 = vpop.f32.mrb[30].mxu1 }
 0x130   :  { %v1008_v39 = vpop.f32.mrb[31].mxu0  ;;  %v1056_v46 = vpop.f32.mrb[31].mxu1 }
 0x131   :  { %682 = vst [vmem:[#allocation3 + $0x70] sm:$0xff] %v1430_v36  ;;  %v745_v43 = vadd.f32 %v1430_v36, %v744_v29  ;;  %v1436_v44 = vadd.f32 %v1008_v39, %v1007_v37  ;;  %698 = vst [vmem:[#allocation3 + $0xf0] sm:$0xff] %v1432_v40  ;;  %v1439_v48 = vadd.f32 %v1056_v46, %v1055_v42 }
 0x133   :  { %683 = vst [vmem:[#allocation3 + $0x78] sm:$0xff] %v1436_v44  ;;  %v746_v50 = vadd.f32 %v1436_v44, %v745_v43  ;;  %699 = vst [vmem:[#allocation3 + $0xf8] sm:$0xff] %v1439_v48 }
 0x135   :  { %v747_v52 = vadd.f32 %v1334_v55, %v746_v50 }
 0x137   :  { %v748_v53 = vadd.f32 %v1340_v59, %v747_v52 }
 0x139   :  { %v749_v54 = vadd.f32 %v1346_v3, %v748_v53 }
 0x13b   :  { %v750_v56 = vadd.f32 %v1352_v7, %v749_v54 }
 0x13d   :  { %v751_v60 = vadd.f32 %v1358_v15, %v750_v56 }
 0x13f   :  { %v752_v61 = vadd.f32 %v1366_v20, %v751_v60 }
 0x141   :  { %v753_v62 = vadd.f32 %v1374_v30, %v752_v61 }
 0x142   :  { %1152 = shalt.err (!%p1149_p4)
}
 0x143   :  { %s1153_s1 = scalar_lea.hbm %s1547_s2, 4096 }
 0x144   :  { %p1154_p5 = scmp.ne.s32.totalorder %s1547_s2, %s1153_s1  ;;  %p1157_p6 = scmp.lt.u32.totalorder %s1153_s1, %s1547_s2 }
 0x146   :  { %p1159_p7 = pnand %p1157_p6, %p1154_p5 }
 0x148   :  { %1162 = shalt.err (!%p1159_p7)
}
 0x149   :  { %s1166_s6 = smov 128   ;;  %s1167_s7 = smov 8   ;;  %v754_v1 = vadd.f32 %v1381_v35, %v753_v62  ;;  %vm871_vm0 = vcmask 1040384   ;;  %vm873_vm1 = vcmask 1041408  }
 0x14a   :  { %887 = dma.vmem_to_hbm [thread:$0]  %s882_s25, 4096, %s1547_s2, [#allocation4], %s1166_s6, %s1166_s6, %s1167_s7  }
 0x14b   :  { %v755_v2 = vadd.f32 %v1389_v45, %v754_v1 }
 0x14d   :  { %v756_v6 = vadd.f32 %v1395_v49, %v755_v2 }
 0x14f   :  { %v757_v9 = vadd.f32 %v1403_v0, %v756_v6 }
 0x151   :  { %v758_v10 = vadd.f32 %v1410_v8, %v757_v9 }
 0x153   :  { %v759_v12 = vadd.f32 %v1418_v22, %v758_v10 }
 0x155   :  { %v760_v13 = vadd.f32 %v1425_v28, %v759_v12 }
 0x157   :  { %v761_v14 = vadd.f32 %v1432_v40, %v760_v13 }
 0x159   :  { %v762_v17 = vadd.f32 %v1439_v48, %v761_v14 }
 0x15b   :  { %v763_v19 = vrot.slane %v762_v17, 4 }
 0x15d   :  { %v764_v21 = vadd.f32 %v763_v19, %v762_v17 }
 0x15f   :  { %v765_v23 = vrot.slane %v764_v21, 2 }
 0x161   :  { %v766_v24 = vadd.f32 %v765_v23, %v764_v21 }
 0x163   :  { %v767_v27 = vrot.slane %v766_v24, 1 }
 0x165   :  { %v1472_v29 = vadd.f32 %v767_v27, %v766_v24 }
 0x167   :  { %v1475_v31 = vmul.f32 0.00390625, %v1472_v29 }
 0x169   :  { %v770_v32 = vsub.f32 %v1332_v51, %v1475_v31  ;;  %v771_v34 = vsub.f32 %v1337_v57, %v1475_v31  ;;  %v772_v37 = vsub.f32 %v1344_v63, %v1475_v31  ;;  %v773_v42 = vsub.f32 %v1349_v5, %v1475_v31 }
 0x16a   :  { %v774_v43 = vsub.f32 %v1356_v11, %v1475_v31  ;;  %v775_v52 = vsub.f32 %v1363_v18, %v1475_v31  ;;  %v776_v57 = vsub.f32 %v1372_v26, %v1475_v31  ;;  %v777_v56 = vsub.f32 %v1378_v33, %v1475_v31 }
 0x16b   :  { %v802_v38 = vmul.f32 %v770_v32, %v770_v32  ;;  %v803_v39 = vmul.f32 %v771_v34, %v771_v34  ;;  %v804_v46 = vmul.f32 %v772_v37, %v772_v37  ;;  %v805_v51 = vmul.f32 %v773_v42, %v773_v42 }
 0x16c   :  { %v806_v54 = vmul.f32 %v774_v43, %v774_v43  ;;  %v807_v60 = vmul.f32 %v775_v52, %v775_v52  ;;  %v778_v11 = vsub.f32 %v1387_v41, %v1475_v31  ;;  %v808_v61 = vmul.f32 %v776_v57, %v776_v57 }
 0x16d   :  { %v834_v50 = vadd.f32 %v803_v39, %v802_v38  ;;  %v779_v18 = vsub.f32 %v1392_v47, %v1475_v31  ;;  %v809_v1 = vmul.f32 %v777_v56, %v777_v56  ;;  %v780_v26 = vsub.f32 %v1401_v58, %v1475_v31 }
 0x16e   :  { %v810_v6 = vmul.f32 %v778_v11, %v778_v11  ;;  %v781_v33 = vsub.f32 %v1407_v4, %v1475_v31  ;;  %v782_v41 = vsub.f32 %v1416_v16, %v1475_v31  ;;  %v783_v47 = vsub.f32 %v1422_v25, %v1475_v31 }
 0x16f   :  { %v835_v53 = vadd.f32 %v834_v50, %v804_v46  ;;  %v811_v10 = vmul.f32 %v779_v18, %v779_v18  ;;  %v812_v13 = vmul.f32 %v780_v26, %v780_v26  ;;  %v784_v58 = vsub.f32 %v1430_v36, %v1475_v31 }
 0x170   :  { %v813_v17 = vmul.f32 %v781_v33, %v781_v33  ;;  %v814_v21 = vmul.f32 %v782_v41, %v782_v41  ;;  %v785_v4 = vsub.f32 %v1436_v44, %v1475_v31  ;;  %v815_v24 = vmul.f32 %v783_v47, %v783_v47 }
 0x171   :  { %v836_v63 = vadd.f32 %v835_v53, %v805_v51  ;;  %v786_v16 = vsub.f32 %v1334_v55, %v1475_v31  ;;  %v816_v32 = vmul.f32 %v784_v58, %v784_v58  ;;  %v787_v25 = vsub.f32 %v1340_v59, %v1475_v31 }
 0x172   :  { %v817_v37 = vmul.f32 %v785_v4, %v785_v4  ;;  %v788_v36 = vsub.f32 %v1346_v3, %v1475_v31  ;;  %v789_v44 = vsub.f32 %v1352_v7, %v1475_v31  ;;  %v790_v55 = vsub.f32 %v1358_v15, %v1475_v31 }
 0x173   :  { %v837_v5 = vadd.f32 %v836_v63, %v806_v54  ;;  %v818_v39 = vmul.f32 %v786_v16, %v786_v16  ;;  %v819_v43 = vmul.f32 %v787_v25, %v787_v25  ;;  %v791_v59 = vsub.f32 %v1366_v20, %v1475_v31 }
 0x174   :  { %v820_v50 = vmul.f32 %v788_v36, %v788_v36  ;;  %v821_v51 = vmul.f32 %v789_v44, %v789_v44  ;;  %v792_v3 = vsub.f32 %v1374_v30, %v1475_v31  ;;  %v822_v57 = vmul.f32 %v790_v55, %v790_v55 }
 0x175   :  { %v838_v62 = vadd.f32 %v837_v5, %v807_v60  ;;  %v793_v7 = vsub.f32 %v1381_v35, %v1475_v31  ;;  %v823_v63 = vmul.f32 %v791_v59, %v791_v59  ;;  %v794_v15 = vsub.f32 %v1389_v45, %v1475_v31 }
 0x176   :  { %v824_v60 = vmul.f32 %v792_v3, %v792_v3  ;;  %v795_v20 = vsub.f32 %v1395_v49, %v1475_v31  ;;  %v796_v30 = vsub.f32 %v1403_v0, %v1475_v31  ;;  %v797_v35 = vsub.f32 %v1410_v8, %v1475_v31 }
 0x177   :  { %v839_v2 = vadd.f32 %v838_v62, %v808_v61  ;;  %v825_v11 = vmul.f32 %v793_v7, %v793_v7  ;;  %v826_v62 = vmul.f32 %v794_v15, %v794_v15  ;;  %v798_v45 = vsub.f32 %v1418_v22, %v1475_v31 }
 0x178   :  { %v828_v26 = vmul.f32 %v796_v30, %v796_v30  ;;  %v799_v49 = vsub.f32 %v1425_v28, %v1475_v31  ;;  %v800_v0 = vsub.f32 %v1432_v40, %v1475_v31  ;;  %v801_v8 = vsub.f32 %v1439_v48, %v1475_v31 }
 0x179   :  { %v840_v9 = vadd.f32 %v839_v2, %v809_v1  ;;  %v827_v1 = vmul.f32 %v795_v20, %v795_v20 }
 0x17a   :  { %v831_v41 = vmul.f32 %v799_v49, %v799_v49  ;;  %v833_v22 = vmul.f32 %v801_v8, %v801_v8 }
 0x17b   :  { %v841_v12 = vadd.f32 %v840_v9, %v810_v6  ;;  %v829_v9 = vmul.f32 %v797_v35, %v797_v35 }
 0x17d   :  { %v842_v14 = vadd.f32 %v841_v12, %v811_v10  ;;  %v830_v10 = vmul.f32 %v798_v45, %v798_v45 }
 0x17f   :  { %v843_v19 = vadd.f32 %v842_v14, %v812_v13  ;;  %v832_v14 = vmul.f32 %v800_v0, %v800_v0 }
 0x181   :  { %v844_v23 = vadd.f32 %v843_v19, %v813_v17 }
 0x183   :  { %v845_v27 = vadd.f32 %v844_v23, %v814_v21 }
 0x185   :  { %v846_v34 = vadd.f32 %v845_v27, %v815_v24 }
 0x187   :  { %v847_v38 = vadd.f32 %v846_v34, %v816_v32 }
 0x189   :  { %v848_v42 = vadd.f32 %v847_v38, %v817_v37 }
 0x18b   :  { %v849_v46 = vadd.f32 %v848_v42, %v818_v39 }
 0x18d   :  { %v850_v52 = vadd.f32 %v849_v46, %v819_v43 }
 0x18f   :  { %v851_v53 = vadd.f32 %v850_v52, %v820_v50 }
 0x191   :  { %v852_v54 = vadd.f32 %v851_v53, %v821_v51 }
 0x193   :  { %v853_v56 = vadd.f32 %v852_v54, %v822_v57 }
 0x195   :  { %v854_v5 = vadd.f32 %v853_v56, %v823_v63 }
 0x197   :  { %v855_v61 = vadd.f32 %v854_v5, %v824_v60 }
 0x199   :  { %v856_v18 = vadd.f32 %v855_v61, %v825_v11 }
 0x19b   :  { %v857_v2 = vadd.f32 %v856_v18, %v826_v62 }
 0x19d   :  { %v858_v6 = vadd.f32 %v857_v2, %v827_v1 }
 0x19f   :  { %v859_v33 = vadd.f32 %v858_v6, %v828_v26 }
 0x1a1   :  { %v860_v12 = vadd.f32 %v859_v33, %v829_v9 }
 0x1a3   :  { %v861_v13 = vadd.f32 %v860_v12, %v830_v10 }
 0x1a5   :  { %v862_v47 = vadd.f32 %v861_v13, %v831_v41 }
 0x1a7   :  { %v863_v17 = vadd.f32 %v862_v47, %v832_v14 }
 0x1a9   :  { %v864_v19 = vadd.f32 %v863_v17, %v833_v22 }
 0x1ab   :  { %v865_v58 = vrot.slane %v864_v19, 4 }
 0x1ad   :  { %v866_v21 = vadd.f32 %v865_v58, %v864_v19 }
 0x1af   :  { %v867_v28 = vrot.slane %v866_v21, 2 }
 0x1b1   :  { %v868_v23 = vadd.f32 %v867_v28, %v866_v21 }
 0x1b3   :  { %v869_v4 = vrot.slane %v868_v23, 1 }
 0x1b5   :  { %v870_v24 = vadd.f32 %v869_v4, %v868_v23 }
 0x1b7   :  { %v872_v40 = vsel %vm871_vm0, %v1472_v29, %v870_v24 }
 0x1b8   :  { %v874_v27 = vsel %vm873_vm1, %v872_v40, 0.0 }
 0x1b9   :  { %875 = vst [vmem:[%s1548_s3] sm:$0xff] %v874_v27 }
 0x1ba   :  { %1163 = dma.done.wait [#allocation4], 4096  }
 0x1bb   :  { %1164 = vsyncadd [#allocation4], 4294963200 }
 0x1bc   :  { %895 = vsyncpa [#allocation4], 1 }

// kernel: gcn_layer.5
= control target key start
LH: loop header
LB: loop body
LE: loop exit
PB: predicated region body
PF: predicated region fallthrough
CT: control target
= control target key end

     0   :  { %7 = vsyncpa [#allocation3], 0  ;;  %s390_s0 = inlined_call_operand.hbm [shape: f32[256,128], index: 0, kind: input, shape index: {}, may-alias: {0,2}]   ;;  %s391_s1 = inlined_call_operand.vmem [shape: f32[8,128], index: 1, kind: input, shape index: {}]   ;;  %s392_s2 = inlined_call_operand.hbm [shape: f32[256,128], index: 2, kind: output, shape index: {}, may-alias: {0,2}]  }
   0x1   :  { %8 = vsyncpa [#allocation4], 0  ;;  %s267_s9 = smov [#allocation2]   ;;  %s219_s13 = scalar_lea.hbm %s390_s0, 4096 }
   0x2   :  { %s14_s10 = sshll.u32 %s267_s9, 4  ;;  %p220_p0 = scmp.ne.s32.totalorder %s390_s0, %s219_s13  ;;  %s15_s10 = int_to_ptr.vmem [resolvable:$true] %s14_s10 }
   0x3   :  { %p223_p1 = scmp.lt.u32.totalorder %s219_s13, %s390_s0 }
   0x5   :  { %p225_p2 = pnand %p223_p1, %p220_p0 }
   0x7   :  { %228 = shalt.err (!%p225_p2)
}
   0x8   :  { %s229_s18 = scalar_lea.vmem %s15_s10, 4096  ;;  %p234_p4 = scmp.lt.s32.totalorder %s15_s10, %s15_s10 }
   0x9   :  { %p230_p3 = scmp.ne.s32.totalorder %s15_s10, %s229_s18  ;;  %p235_p5 = scmp.lt.s32.totalorder %s229_s18, %s229_s18 }
   0xb   :  { %p236_p6 = por %p235_p5, %p234_p4 }
   0xd   :  { %p237_p7 = pnand %p236_p6, %p230_p3 }
   0xf   :  { %240 = shalt.err (!%p237_p7)
}
  0x10   :  { %s268_s19 = smov 128   ;;  %s269_s20 = smov 8  }
  0x11   :  { %20 = dma.hbm_to_vmem [thread:$0]  %s390_s0, 4096, %s15_s10, [#allocation3], %s268_s19, %s268_s19, %s269_s20  }
  0x12   :  { %263 = dma.done.wait [#allocation3], 4096  }
  0x13   :  { %264 = vsyncadd [#allocation3], 4294963200  ;;  %v304_v0 = vld [vmem:[%s391_s1] ss:$0 sm:$0xff]  ;;  %v309_v1 = vld [vmem:[%s391_s1 + $0x1] ss:$0 sm:$0xff] }
  0x14   :  { %v28_v2 = vld [vmem:[#allocation2] sm:$0xff]  ;;  %v29_v4 = vld [vmem:[#allocation2 + $0x8] sm:$0xff]  ;;  %v30_v5 = vld [vmem:[#allocation2 + $0x10] sm:$0xff]  ;;  %s270_s0 = smov [#allocation5]  }
  0x15   :  { %v64_v3 = vsub.f32 %v28_v2, %v304_v0  ;;  %v31_v6 = vld [vmem:[#allocation2 + $0x18] sm:$0xff]  ;;  %v65_v7 = vsub.f32 %v29_v4, %v304_v0  ;;  %v66_v8 = vsub.f32 %v30_v5, %v304_v0  ;;  %v32_v10 = vld [vmem:[#allocation2 + $0x20] sm:$0xff]  ;;  %v33_v11 = vld [vmem:[#allocation2 + $0x28] sm:$0xff]  ;;  %s201_s1 = sshll.u32 %s270_s0, 4  ;;  %s202_s1 = int_to_ptr.vmem [resolvable:$true] %s201_s1 }
  0x16   :  { %v67_v9 = vsub.f32 %v31_v6, %v304_v0  ;;  %v34_v12 = vld [vmem:[#allocation2 + $0x30] sm:$0xff]  ;;  %v68_v14 = vsub.f32 %v32_v10, %v304_v0  ;;  %v69_v15 = vsub.f32 %v33_v11, %v304_v0  ;;  %v35_v17 = vld [vmem:[#allocation2 + $0x38] sm:$0xff]  ;;  %v36_v22 = vld [vmem:[#allocation2 + $0x40] sm:$0xff]  ;;  %s241_s27 = scalar_lea.vmem %s202_s1, 4096  ;;  %p246_p9 = scmp.lt.s32.totalorder %s202_s1, %s202_s1 }
  0x17   :  { %v100_v13 = vmul.f32 %v309_v1, %v64_v3  ;;  %v70_v16 = vsub.f32 %v34_v12, %v304_v0  ;;  %v101_v18 = vmul.f32 %v309_v1, %v65_v7  ;;  %v102_v19 = vmul.f32 %v309_v1, %v66_v8  ;;  %v37_v27 = vld [vmem:[#allocation2 + $0x48] sm:$0xff]  ;;  %v38_v28 = vld [vmem:[#allocation2 + $0x50] sm:$0xff]  ;;  %v39_v29 = vld [vmem:[#allocation2 + $0x58] sm:$0xff]  ;;  %p242_p8 = scmp.ne.s32.totalorder %s202_s1, %s241_s27  ;;  %p247_p10 = scmp.lt.s32.totalorder %s241_s27, %s241_s27 }
  0x18   :  { %v103_v20 = vmul.f32 %v309_v1, %v67_v9  ;;  %v71_v21 = vsub.f32 %v35_v17, %v304_v0  ;;  %v104_v24 = vmul.f32 %v309_v1, %v68_v14  ;;  %v105_v25 = vmul.f32 %v309_v1, %v69_v15  ;;  %v40_v34 = vld [vmem:[#allocation2 + $0x60] sm:$0xff]  ;;  %v41_v35 = vld [vmem:[#allocation2 + $0x68] sm:$0xff]  ;;  %v42_v36 = vld [vmem:[#allocation2 + $0x70] sm:$0xff] }
  0x19   :  { %v132_v23 = vmax.f32 %v100_v13, 0.0  ;;  %v106_v26 = vmul.f32 %v309_v1, %v70_v16  ;;  %v133_v30 = vmax.f32 %v101_v18, 0.0  ;;  %v134_v31 = vmax.f32 %v102_v19, 0.0  ;;  %v43_v41 = vld [vmem:[#allocation2 + $0x78] sm:$0xff]  ;;  %v44_v54 = vld [vmem:[#allocation2 + $0x80] sm:$0xff]  ;;  %v45_v59 = vld [vmem:[#allocation2 + $0x88] sm:$0xff]  ;;  %p248_p11 = por %p247_p10, %p246_p9 }
  0x1a   :  { %v135_v32 = vmax.f32 %v103_v20, 0.0  ;;  %v107_v33 = vmul.f32 %v309_v1, %v71_v21  ;;  %v136_v37 = vmax.f32 %v104_v24, 0.0  ;;  %v137_v38 = vmax.f32 %v105_v25, 0.0  ;;  %v46_v60 = vld [vmem:[#allocation2 + $0x90] sm:$0xff]  ;;  %v47_v61 = vld [vmem:[#allocation2 + $0x98] sm:$0xff]  ;;  %v48_v4 = vld [vmem:[#allocation2 + $0xa0] sm:$0xff] }
  0x1b   :  { %164 = vst [vmem:[#allocation5] sm:$0xff] %v132_v23  ;;  %v138_v39 = vmax.f32 %v106_v26, 0.0  ;;  %v72_v40 = vsub.f32 %v36_v22, %v304_v0  ;;  %165 = vst [vmem:[#allocation5 + $0x8] sm:$0xff] %v133_v30  ;;  %v73_v43 = vsub.f32 %v37_v27, %v304_v0  ;;  %v74_v44 = vsub.f32 %v38_v28, %v304_v0  ;;  %v49_v5 = vld [vmem:[#allocation2 + $0xa8] sm:$0xff]  ;;  %v50_v6 = vld [vmem:[#allocation2 + $0xb0] sm:$0xff]  ;;  %p249_p12 = pnand %p248_p11, %p242_p8 }
  0x1c   :  { %166 = vst [vmem:[#allocation5 + $0x10] sm:$0xff] %v134_v31  ;;  %167 = vst [vmem:[#allocation5 + $0x18] sm:$0xff] %v135_v32  ;;  %v139_v42 = vmax.f32 %v107_v33, 0.0  ;;  %v75_v45 = vsub.f32 %v39_v29, %v304_v0  ;;  %v76_v47 = vsub.f32 %v40_v34, %v304_v0  ;;  %v77_v48 = vsub.f32 %v41_v35, %v304_v0  ;;  %v51_v11 = vld [vmem:[#allocation2 + $0xb8] sm:$0xff]  ;;  %v52_v24 = vld [vmem:[#allocation2 + $0xc0] sm:$0xff] }
  0x1d   :  { %168 = vst [vmem:[#allocation5 + $0x20] sm:$0xff] %v136_v37  ;;  %169 = vst [vmem:[#allocation5 + $0x28] sm:$0xff] %v137_v38  ;;  %v108_v46 = vmul.f32 %v309_v1, %v72_v40  ;;  %v78_v49 = vsub.f32 %v42_v36, %v304_v0  ;;  %v109_v50 = vmul.f32 %v309_v1, %v73_v43  ;;  %v53_v29 = vld [vmem:[#allocation2 + $0xc8] sm:$0xff]  ;;  %v54_v30 = vld [vmem:[#allocation2 + $0xd0] sm:$0xff] }
  0x1e   :  { %170 = vst [vmem:[#allocation5 + $0x30] sm:$0xff] %v138_v39  ;;  %171 = vst [vmem:[#allocation5 + $0x38] sm:$0xff] %v139_v42  ;;  %v110_v51 = vmul.f32 %v309_v1, %v74_v44  ;;  %v111_v52 = vmul.f32 %v309_v1, %v75_v45  ;;  %v79_v53 = vsub.f32 %v43_v41, %v304_v0  ;;  %v55_v31 = vld [vmem:[#allocation2 + $0xd8] sm:$0xff]  ;;  %v56_v36 = vld [vmem:[#allocation2 + $0xe0] sm:$0xff] }
  0x1f   :  { %v140_v55 = vmax.f32 %v108_v46, 0.0  ;;  %v112_v56 = vmul.f32 %v309_v1, %v76_v47  ;;  %v113_v57 = vmul.f32 %v309_v1, %v77_v48  ;;  %v114_v58 = vmul.f32 %v309_v1, %v78_v49  ;;  %v57_v37 = vld [vmem:[#allocation2 + $0xe8] sm:$0xff]  ;;  %v58_v38 = vld [vmem:[#allocation2 + $0xf0] sm:$0xff]  ;;  %v59_v43 = vld [vmem:[#allocation2 + $0xf8] sm:$0xff] }
  0x20   :  { %v141_v62 = vmax.f32 %v109_v50, 0.0  ;;  %v142_v63 = vmax.f32 %v110_v51, 0.0  ;;  %v143_v2 = vmax.f32 %v111_v52, 0.0  ;;  %v115_v3 = vmul.f32 %v309_v1, %v79_v53 }
  0x21   :  { %172 = vst [vmem:[#allocation5 + $0x40] sm:$0xff] %v140_v55  ;;  %v144_v7 = vmax.f32 %v112_v56, 0.0  ;;  %v145_v8 = vmax.f32 %v113_v57, 0.0  ;;  %v146_v9 = vmax.f32 %v114_v58, 0.0  ;;  %v80_v10 = vsub.f32 %v44_v54, %v304_v0 }
  0x22   :  { %173 = vst [vmem:[#allocation5 + $0x48] sm:$0xff] %v141_v62  ;;  %174 = vst [vmem:[#allocation5 + $0x50] sm:$0xff] %v142_v63  ;;  %v147_v12 = vmax.f32 %v115_v3, 0.0  ;;  %v81_v13 = vsub.f32 %v45_v59, %v304_v0  ;;  %v82_v14 = vsub.f32 %v46_v60, %v304_v0  ;;  %v83_v15 = vsub.f32 %v47_v61, %v304_v0 }
  0x23   :  { %175 = vst [vmem:[#allocation5 + $0x58] sm:$0xff] %v143_v2  ;;  %176 = vst [vmem:[#allocation5 + $0x60] sm:$0xff] %v144_v7  ;;  %v116_v16 = vmul.f32 %v309_v1, %v80_v10  ;;  %v84_v17 = vsub.f32 %v48_v4, %v304_v0  ;;  %v85_v18 = vsub.f32 %v49_v5, %v304_v0 }
  0x24   :  { %177 = vst [vmem:[#allocation5 + $0x68] sm:$0xff] %v145_v8  ;;  %178 = vst [vmem:[#allocation5 + $0x70] sm:$0xff] %v146_v9  ;;  %v86_v19 = vsub.f32 %v50_v6, %v304_v0  ;;  %v117_v20 = vmul.f32 %v309_v1, %v81_v13  ;;  %v118_v21 = vmul.f32 %v309_v1, %v82_v14 }
  0x25   :  { %179 = vst [vmem:[#allocation5 + $0x78] sm:$0xff] %v147_v12  ;;  %v119_v22 = vmul.f32 %v309_v1, %v83_v15  ;;  %v87_v23 = vsub.f32 %v51_v11, %v304_v0  ;;  %v148_v25 = vmax.f32 %v116_v16, 0.0  ;;  %v120_v26 = vmul.f32 %v309_v1, %v84_v17 }
  0x26   :  { %v121_v27 = vmul.f32 %v309_v1, %v85_v18  ;;  %v122_v28 = vmul.f32 %v309_v1, %v86_v19  ;;  %v149_v32 = vmax.f32 %v117_v20, 0.0  ;;  %v150_v33 = vmax.f32 %v118_v21, 0.0 }
  0x27   :  { %v151_v34 = vmax.f32 %v119_v22, 0.0  ;;  %v123_v35 = vmul.f32 %v309_v1, %v87_v23  ;;  %180 = vst [vmem:[#allocation5 + $0x80] sm:$0xff] %v148_v25  ;;  %v152_v39 = vmax.f32 %v120_v26, 0.0  ;;  %v88_v42 = vsub.f32 %v52_v24, %v304_v0 }
  0x28   :  { %v153_v40 = vmax.f32 %v121_v27, 0.0  ;;  %v154_v41 = vmax.f32 %v122_v28, 0.0  ;;  %181 = vst [vmem:[#allocation5 + $0x88] sm:$0xff] %v149_v32  ;;  %182 = vst [vmem:[#allocation5 + $0x90] sm:$0xff] %v150_v33  ;;  %v89_v45 = vsub.f32 %v53_v29, %v304_v0  ;;  %v90_v46 = vsub.f32 %v54_v30, %v304_v0 }
  0x29   :  { %183 = vst [vmem:[#allocation5 + $0x98] sm:$0xff] %v151_v34  ;;  %v155_v44 = vmax.f32 %v123_v35, 0.0  ;;  %v91_v47 = vsub.f32 %v55_v31, %v304_v0  ;;  %184 = vst [vmem:[#allocation5 + $0xa0] sm:$0xff] %v152_v39  ;;  %v124_v48 = vmul.f32 %v309_v1, %v88_v42  ;;  %v92_v49 = vsub.f32 %v56_v36, %v304_v0 }
  0x2a   :  { %185 = vst [vmem:[#allocation5 + $0xa8] sm:$0xff] %v153_v40  ;;  %186 = vst [vmem:[#allocation5 + $0xb0] sm:$0xff] %v154_v41  ;;  %v93_v50 = vsub.f32 %v57_v37, %v304_v0  ;;  %v94_v51 = vsub.f32 %v58_v38, %v304_v0  ;;  %v125_v52 = vmul.f32 %v309_v1, %v89_v45 }
  0x2b   :  { %187 = vst [vmem:[#allocation5 + $0xb8] sm:$0xff] %v155_v44  ;;  %v126_v53 = vmul.f32 %v309_v1, %v90_v46  ;;  %v127_v54 = vmul.f32 %v309_v1, %v91_v47  ;;  %v95_v55 = vsub.f32 %v59_v43, %v304_v0  ;;  %v156_v56 = vmax.f32 %v124_v48, 0.0 }
  0x2c   :  { %v128_v57 = vmul.f32 %v309_v1, %v92_v49  ;;  %v129_v58 = vmul.f32 %v309_v1, %v93_v50  ;;  %v130_v59 = vmul.f32 %v309_v1, %v94_v51  ;;  %v157_v60 = vmax.f32 %v125_v52, 0.0 }
  0x2d   :  { %v158_v61 = vmax.f32 %v126_v53, 0.0  ;;  %v159_v62 = vmax.f32 %v127_v54, 0.0  ;;  %v131_v63 = vmul.f32 %v309_v1, %v95_v55  ;;  %188 = vst [vmem:[#allocation5 + $0xc0] sm:$0xff] %v156_v56 }
  0x2e   :  { %v160_v2 = vmax.f32 %v128_v57, 0.0  ;;  %v161_v3 = vmax.f32 %v129_v58, 0.0  ;;  %v162_v4 = vmax.f32 %v130_v59, 0.0  ;;  %189 = vst [vmem:[#allocation5 + $0xc8] sm:$0xff] %v157_v60 }
  0x2f   :  { %190 = vst [vmem:[#allocation5 + $0xd0] sm:$0xff] %v158_v61  ;;  %191 = vst [vmem:[#allocation5 + $0xd8] sm:$0xff] %v159_v62  ;;  %v163_v0 = vmax.f32 %v131_v63, 0.0 }
  0x30   :  { %192 = vst [vmem:[#allocation5 + $0xe0] sm:$0xff] %v160_v2  ;;  %193 = vst [vmem:[#allocation5 + $0xe8] sm:$0xff] %v161_v3 }
  0x31   :  { %194 = vst [vmem:[#allocation5 + $0xf0] sm:$0xff] %v162_v4  ;;  %195 = vst [vmem:[#allocation5 + $0xf8] sm:$0xff] %v163_v0 }
  0x32   :  { %252 = shalt.err (!%p249_p12)
}
  0x33   :  { %s253_s30 = scalar_lea.hbm %s392_s2, 4096 }
  0x34   :  { %p254_p13 = scmp.ne.s32.totalorder %s392_s2, %s253_s30  ;;  %p257_p0 = scmp.lt.u32.totalorder %s253_s30, %s392_s2 }
  0x36   :  { %p259_p1 = pnand %p257_p0, %p254_p13 }
  0x38   :  { %262 = shalt.err (!%p259_p1)
}
  0x39   :  { %207 = dma.vmem_to_hbm [thread:$0]  %s202_s1, 4096, %s392_s2, [#allocation4], %s268_s19, %s268_s19, %s269_s20  }
  0x3a   :  { %265 = dma.done.wait [#allocation4], 4096  }
  0x3b   :  { %266 = vsyncadd [#allocation4], 4294963200 }
  0x3c   :  { %211 = vsyncpa [#allocation3], 1 }
  0x3d   :  { %212 = vsyncpa [#allocation4], 1 }

</bundles_post_ra>
